<compile_context>
chip_gen: v6e
topology: v6e:2x2x1
jax: 0.10.0
libtpu: 0.0.40
codegen_flags: <defaults>
</compile_context>

<pallas_src>
import math

import jax
import jax.numpy as jnp
from jax import lax
from jax.experimental import pallas as pl
from jax.experimental.pallas import tpu as pltpu


def _round_up(x: int, m: int) -> int:
    return (x + m - 1) // m * m


def _projection_kernel(gamma_ref, beta_ref, x_ref, w_ref, b_ref, o_ref, y_ref):
    # gamma_ref / beta_ref : (1, 1) f32 scalars in SMEM
    # x_ref : (TM, d_model) f32        w_ref : (TN, d_model) bf16 (PyTorch layout)
    # b_ref : (1, TN) f32              o_ref : (TM, TN)
    # y_ref : VMEM scratch (TM, d_model) bf16 — normalized x, reused across vocab tiles.

    # LayerNorm only once per row tile (j == 0), stash normalized rows in scratch.
    @pl.when(pl.program_id(1) == 0)
    def _():
        x = x_ref[...].astype(jnp.float32)
        d = x.shape[-1]
        mean = jnp.mean(x, axis=-1, keepdims=True)
        centered = x - mean
        # torch.std default: unbiased estimator (divide by n-1).
        var = jnp.sum(centered * centered, axis=-1, keepdims=True) / (d - 1)
        std = jnp.sqrt(var)
        inv = pl.reciprocal(std + 1e-9, approx=True)        # EUP slot, ~free
        gamma = gamma_ref[0, 0]
        beta = beta_ref[0, 0]
        y = centered * (gamma * inv) + beta                  # folded scale
        y_ref[...] = y.astype(jnp.bfloat16)

    # MXU matmul: (TM, d) x (TN, d) contracting on d  -> (TM, TN), f32 accumulate.
    acc = lax.dot_general(
        y_ref[...],
        w_ref[...],
        dimension_numbers=(((1,), (1,)), ((), ())),
        preferred_element_type=jnp.float32,
    )
    o_ref[...] = (acc + b_ref[...].astype(jnp.float32)).astype(o_ref.dtype)


def projection_layer(x, weight, bias, gamma, beta, *, tm_max=256, tn_max=1024):
    """x: [B, S, d_model]; weight: [vocab, d_model] (PyTorch layout); bias: [vocab];
    gamma, beta: scalar parameters of the custom LayerNormalization."""
    B, S, d_model = x.shape
    vocab = weight.shape[0]
    rows = B * S

    # Tile sizes: with bf16 weights, (tm_max=256, tn_max=1024, full K) fits well
    # under v7x's 64 MiB VMEM with double buffering; tn_max can be raised to
    # 2048 on v5e/v6e (128 MiB VMEM).
    tm = min(tm_max, _round_up(rows, 8))
    tn = min(tn_max, _round_up(vocab, 128))
    rows_p = _round_up(rows, tm)
    vocab_p = _round_up(vocab, tn)

    x2d = x.reshape(rows, d_model)
    if rows_p != rows:
        x2d = jnp.pad(x2d, ((0, rows_p - rows), (0, 0)))

    # Keep [vocab, d_model] layout (no transposed copy in HBM); cast weights to
    # bf16 so weight streaming is halved and the MXU runs at bf16 rate.
    w_bf16 = weight.astype(jnp.bfloat16)
    b2d = bias.astype(jnp.float32).reshape(1, vocab)
    if vocab_p != vocab:
        w_bf16 = jnp.pad(w_bf16, ((0, vocab_p - vocab), (0, 0)))
        b2d = jnp.pad(b2d, ((0, 0), (0, vocab_p - vocab)))

    g = jnp.asarray(gamma, jnp.float32).reshape(1, 1)
    bt = jnp.asarray(beta, jnp.float32).reshape(1, 1)

    grid = (rows_p // tm, vocab_p // tn)

    cost = pl.CostEstimate(
        flops=2 * rows_p * d_model * vocab_p,
        transcendentals=rows_p,
        bytes_accessed=(rows_p * d_model * 4        # x (f32)
                        + vocab_p * d_model * 2     # weight (bf16)
                        + vocab_p * 4               # bias (f32)
                        + rows_p * vocab_p * 4),    # output (f32)
    )

    out2d = pl.pallas_call(
        _projection_kernel,
        out_shape=jax.ShapeDtypeStruct((rows_p, vocab_p), x.dtype),
        grid=grid,
        in_specs=[
            pl.BlockSpec((1, 1), lambda i, j: (0, 0),
                         memory_space=pltpu.MemorySpace.SMEM),   # gamma
            pl.BlockSpec((1, 1), lambda i, j: (0, 0),
                         memory_space=pltpu.MemorySpace.SMEM),   # beta
            pl.BlockSpec((tm, d_model), lambda i, j: (i, 0)),    # x row tile
            pl.BlockSpec((tn, d_model), lambda i, j: (j, 0)),    # weight vocab tile
            pl.BlockSpec((1, tn), lambda i, j: (0, j)),          # bias tile
        ],
        out_specs=pl.BlockSpec((tm, tn), lambda i, j: (i, j)),
        scratch_shapes=[pltpu.VMEM((tm, d_model), jnp.bfloat16)],
        compiler_params=pltpu.CompilerParams(
            # Row tiles are fully independent -> parallel (megacore sharding).
            # Vocab axis stays "arbitrary": the normalized-x scratch is written
            # at j == 0 and reused for j > 0 of the same row tile.
            dimension_semantics=("parallel", "arbitrary"),
            vmem_limit_bytes=48 * 1024 * 1024,
        ),
        cost_estimate=cost,
    )(g, bt, x2d, w_bf16, b2d)

    return out2d[:rows, :vocab].reshape(B, S, vocab)


def _reference(x, weight, bias, gamma, beta, eps=1e-09):
    mean = jnp.mean(x, axis=-1, keepdims=True)
    var = jnp.sum((x - mean) ** 2, axis=-1, keepdims=True) / (x.shape[-1] - 1)
    std = jnp.sqrt(var)
    y = gamma * (x - mean) / (std + eps) + beta
    return y @ weight.T + bias


def _run_case(batch, seq, d_model, vocab_size, seed):
    key = jax.random.PRNGKey(seed)
    kx, kw, kb = jax.random.split(key, 3)
    x = jax.random.normal(kx, (batch, seq, d_model), dtype=jnp.float32)
    bound = 1.0 / math.sqrt(d_model)
    weight = jax.random.uniform(kw, (vocab_size, d_model), jnp.float32, -bound, bound)
    bias = jax.random.uniform(kb, (vocab_size,), jnp.float32, -bound, bound)
    gamma = jnp.float32(1.0)   # LayerNormalization.gamma init = ones(1)
    beta = jnp.float32(0.0)    # LayerNormalization.betta init = zeros(1)

    out = projection_layer(x, weight, bias, gamma, beta)
    out = jax.block_until_ready(out)
    ref = _reference(x, weight, bias, gamma, beta)

    assert out.shape == (batch, seq, vocab_size)
    # bf16 MXU operands vs f32 reference -> tolerate bf16-level rounding.
    assert jnp.allclose(out, ref, atol=3e-2, rtol=3e-2), "mismatch vs reference"


if __name__ == "__main__":
    # Shapes consistent with the module: (batch, seq, d_model) -> (batch, seq, vocab).
    _run_case(batch=2, seq=8, d_model=32, vocab_size=128, seed=0)
    # Ragged case exercising the row/vocab padding path.
    _run_case(batch=2, seq=5, d_model=32, vocab_size=200, seed=1)
    print("KERNEL_OK")
</pallas_src>

<mosaic_0001>
module attributes {stable_mosaic.version = 11 : i64} {
  func.func @_projection_kernel(%arg0: i32, %arg1: i32, %arg2: memref<1x1xf32, #tpu.memory_space<smem>>, %arg3: memref<1x1xf32, #tpu.memory_space<smem>>, %arg4: memref<16x32xf32, #tpu.memory_space<vmem>>, %arg5: memref<128x32xbf16, #tpu.memory_space<vmem>>, %arg6: memref<1x128xf32, #tpu.memory_space<vmem>>, %arg7: memref<16x128xf32, #tpu.memory_space<vmem>>, %arg8: memref<16x32xbf16, #tpu.memory_space<vmem>>) attributes {dimension_semantics = [#tpu.dimension_semantics<parallel>, #tpu.dimension_semantics<arbitrary>], iteration_bounds = array<i64: 1, 1>, scalar_prefetch = 0 : i64, scratch_operands = 1 : i64, tpu.core_type = #tpu.core_type<tc>, window_params = [{transform_indices = @transform_0, window_bounds = array<i64: 1, 1>}, {transform_indices = @transform_1, window_bounds = array<i64: 1, 1>}, {transform_indices = @transform_2, window_bounds = array<i64: 16, 32>}, {transform_indices = @transform_3, window_bounds = array<i64: 128, 32>}, {transform_indices = @transform_4, window_bounds = array<i64: 1, 128>}, {transform_indices = @transform_5, window_bounds = array<i64: 16, 128>}]} {
    %c0_i32 = arith.constant 0 : i32
    %0 = arith.cmpi eq, %arg1, %c0_i32 : i32
    %1 = arith.extui %0 : i1 to i32
    %c0_i32_0 = arith.constant 0 : i32
    %2 = arith.cmpi ne, %1, %c0_i32_0 : i32
    scf.if %2 {
      %c0_8 = arith.constant 0 : index
      %c0_9 = arith.constant 0 : index
      %10 = vector.load %arg4[%c0_8, %c0_9] : memref<16x32xf32, #tpu.memory_space<vmem>>, vector<16x32xf32>
      %cst_10 = arith.constant dense<0.000000e+00> : vector<16xf32>
      %11 = vector.multi_reduction <add>, %10, %cst_10 [1] : vector<16x32xf32> to vector<16xf32>
      %12 = vector.shape_cast %11 : vector<16xf32> to vector<16x1xf32>
      %cst_11 = arith.constant 3.200000e+01 : f32
      %13 = vector.broadcast %cst_11 : f32 to vector<16x1xf32>
      %14 = arith.divf %12, %13 : vector<16x1xf32>
      %15 = vector.broadcast %14 : vector<16x1xf32> to vector<16x32xf32>
      %16 = arith.subf %10, %15 : vector<16x32xf32>
      %17 = arith.mulf %16, %16 : vector<16x32xf32>
      %cst_12 = arith.constant dense<0.000000e+00> : vector<16xf32>
      %18 = vector.multi_reduction <add>, %17, %cst_12 [1] : vector<16x32xf32> to vector<16xf32>
      %19 = vector.shape_cast %18 : vector<16xf32> to vector<16x1xf32>
      %cst_13 = arith.constant 3.100000e+01 : f32
      %20 = vector.broadcast %cst_13 : f32 to vector<16x1xf32>
      %21 = arith.divf %19, %20 : vector<16x1xf32>
      %22 = math.sqrt %21 : vector<16x1xf32>
      %cst_14 = arith.constant 9.99999971E-10 : f32
      %23 = vector.broadcast %cst_14 : f32 to vector<16x1xf32>
      %24 = arith.addf %22, %23 : vector<16x1xf32>
      %25 = tpu.reciprocal %24 {approx = true} : vector<16x1xf32> -> vector<16x1xf32>
      %c0_15 = arith.constant 0 : index
      %c0_16 = arith.constant 0 : index
      %26 = memref.load %arg2[%c0_15, %c0_16] : memref<1x1xf32, #tpu.memory_space<smem>>
      %c0_17 = arith.constant 0 : index
      %c0_18 = arith.constant 0 : index
      %27 = memref.load %arg3[%c0_17, %c0_18] : memref<1x1xf32, #tpu.memory_space<smem>>
      %28 = vector.broadcast %26 : f32 to vector<16x1xf32>
      %29 = arith.mulf %28, %25 : vector<16x1xf32>
      %30 = vector.broadcast %29 : vector<16x1xf32> to vector<16x32xf32>
      %31 = arith.mulf %16, %30 : vector<16x32xf32>
      %32 = vector.broadcast %27 : f32 to vector<16x32xf32>
      %33 = arith.addf %31, %32 : vector<16x32xf32>
      %34 = arith.truncf %33 : vector<16x32xf32> to vector<16x32xbf16>
      %c0_19 = arith.constant 0 : index
      %c0_20 = arith.constant 0 : index
      %35 = vector.load %arg8[%c0_19, %c0_20] : memref<16x32xbf16, #tpu.memory_space<vmem>>, vector<16x32xbf16>
      tpu.vector_store %arg8[%c0_19, %c0_20], %34 {strides = array<i32>} : memref<16x32xbf16, #tpu.memory_space<vmem>>, vector<16x32xbf16>,
    } else {
    }
    %c0 = arith.constant 0 : index
    %c0_1 = arith.constant 0 : index
    %3 = vector.load %arg8[%c0, %c0_1] : memref<16x32xbf16, #tpu.memory_space<vmem>>, vector<16x32xbf16>
    %c0_2 = arith.constant 0 : index
    %c0_3 = arith.constant 0 : index
    %4 = vector.load %arg5[%c0_2, %c0_3] : memref<128x32xbf16, #tpu.memory_space<vmem>>, vector<128x32xbf16>
    %cst = arith.constant dense<0.000000e+00> : vector<16x128xf32>
    %5 = tpu.matmul %3, %4, %cst {dimension_numbers = #tpu.dot_dimension_numbers<[1], [1], [0], [0], [0, 0, 1, 0], [], []>} : vector<16x32xbf16>, vector<128x32xbf16>, vector<16x128xf32> -> vector<16x128xf32>
    %c0_4 = arith.constant 0 : index
    %c0_5 = arith.constant 0 : index
    %6 = vector.load %arg6[%c0_4, %c0_5] : memref<1x128xf32, #tpu.memory_space<vmem>>, vector<1x128xf32>
    %7 = vector.broadcast %6 : vector<1x128xf32> to vector<16x128xf32>
    %8 = arith.addf %5, %7 : vector<16x128xf32>
    %c0_6 = arith.constant 0 : index
    %c0_7 = arith.constant 0 : index
    %9 = vector.load %arg7[%c0_6, %c0_7] : memref<16x128xf32, #tpu.memory_space<vmem>>, vector<16x128xf32>
    tpu.vector_store %arg7[%c0_6, %c0_7], %8 {strides = array<i32>} : memref<16x128xf32, #tpu.memory_space<vmem>>, vector<16x128xf32>,
    return
  }
  func.func @transform_0(%arg0: i32, %arg1: i32) -> (i32, i32) {
    %c0_i32 = arith.constant 0 : i32
    %c0_i32_0 = arith.constant 0 : i32
    %c0_i32_1 = arith.constant 0 : i32
    return %c0_i32, %c0_i32_0 : i32, i32
  }
  func.func @transform_1(%arg0: i32, %arg1: i32) -> (i32, i32) {
    %c0_i32 = arith.constant 0 : i32
    %c0_i32_0 = arith.constant 0 : i32
    %c0_i32_1 = arith.constant 0 : i32
    return %c0_i32, %c0_i32_0 : i32, i32
  }
  func.func @transform_2(%arg0: i32, %arg1: i32) -> (i32, i32) {
    %c0_i32 = arith.constant 0 : i32
    %c0_i32_0 = arith.constant 0 : i32
    return %arg0, %c0_i32 : i32, i32
  }
  func.func @transform_3(%arg0: i32, %arg1: i32) -> (i32, i32) {
    %c0_i32 = arith.constant 0 : i32
    %c0_i32_0 = arith.constant 0 : i32
    return %arg1, %c0_i32 : i32, i32
  }
  func.func @transform_4(%arg0: i32, %arg1: i32) -> (i32, i32) {
    %c0_i32 = arith.constant 0 : i32
    %c0_i32_0 = arith.constant 0 : i32
    return %c0_i32, %arg1 : i32, i32
  }
  func.func @transform_5(%arg0: i32, %arg1: i32) -> (i32, i32) {
    %c0_i32 = arith.constant 0 : i32
    return %arg0, %arg1 : i32, i32
  }
}

</mosaic_0001>

<bundles_post_ra>
// kernel: tpu_custom_call.1
= control target key start
LH: loop header
LB: loop body
LE: loop exit
PB: predicated region body
PF: predicated region fallthrough
CT: control target
= control target key end

     0   :  { %vm30_vm0 = vcmask 261120   ;;  %s437_s0 = inlined_call_operand.<no memory space> [shape: f32[1,1], index: 0, kind: input, shape index: {}]   ;;  %s438_s1 = inlined_call_operand.<no memory space> [shape: f32[1,1], index: 1, kind: input, shape index: {}]   ;;  %s439_s2 = inlined_call_operand.vmem [shape: f32[16,32], index: 2, kind: input, shape index: {}]   ;;  %s440_s3 = inlined_call_operand.vmem [shape: bf16[128,32], index: 3, kind: input, shape index: {}]   ;;  %s441_s4 = inlined_call_operand.vmem [shape: f32[1,128], index: 4, kind: input, shape index: {}]   ;;  %s442_s5 = inlined_call_operand.hbm [shape: f32[16,128], index: 5, kind: output, shape index: {}]  }
   0x1   :  { %v28_v0 = vld [vmem:[%s439_s2] sm:$0xff]  ;;  %v29_v1 = vld [vmem:[%s439_s2 + $0x8] sm:$0xff] }
   0x2   :  { %v31_v2 = vsel %vm30_vm0, %v28_v0, 0.0  ;;  %v34_v3 = vsel %vm30_vm0, %v29_v1, 0.0 }
   0x3   :  { %32 = vadd.xlane.f32.xlu0 %v31_v2 }
   0x7   :  { %35 = vadd.xlane.f32.xlu0 %v34_v3 }
   0x8   :  { %12 = vsyncpa [#allocation6], 0  ;;  %v298_v4 = vld [vmem:[%s440_s3 + $0x38] sm:$0xff]   ;;  %v337_v5 = vmov 0.0   ;;  %v299_v17 = vld [vmem:[%s440_s3 + $0x30] sm:$0xff]   ;;  %vm338_vm1 = vmmov 0   ;;  %v73_v47 = vstv %s437_s0  ;;  %v78_v50 = vstv %s438_s1 }
   0x9   :  { %273 = vmatprep.subr.bf16.mxu0 %v337_v5  ;;  %v188_v6 = vsel %vm30_vm0, %v298_v4, 0  ;;  %v185_v18 = vsel %vm30_vm0, %v299_v17, 0  ;;  %v300_v19 = vld [vmem:[%s440_s3 + $0x28] sm:$0xff]   ;;  %v301_v21 = vld [vmem:[%s440_s3 + $0x20] sm:$0xff]   ;;  %v302_v23 = vld [vmem:[%s440_s3 + $0x18] sm:$0xff]   ;;  %289 = vmatprep.mubr.msk.bf16.mxu0 %vm338_vm1, %v337_v5  ;;  %vm89_vm6 = vcmask 257024  }
   0xa   :  { %274 = vmatpush3.bf16.xpose.msra.mxu0 %v188_v6  ;;  %v182_v20 = vsel %vm30_vm0, %v300_v19, 0  ;;  %v179_v22 = vsel %vm30_vm0, %v301_v21, 0  ;;  %v176_v24 = vsel %vm30_vm0, %v302_v23, 0  ;;  %v303_v25 = vld [vmem:[%s440_s3 + $0x10] sm:$0xff]   ;;  %v304_v27 = vld [vmem:[%s440_s3 + $0x8] sm:$0xff]   ;;  %v305_v29 = vld [vmem:[%s440_s3] sm:$0xff]  }
   0xb   :  { %275 = vmatprep.subr.bf16.mxu0 %v337_v5  ;;  %v173_v26 = vsel %vm30_vm0, %v303_v25, 0  ;;  %v170_v28 = vsel %vm30_vm0, %v304_v27, 0  ;;  %v167_v30 = vsel %vm30_vm0, %v305_v29, 0  ;;  %v251_v60 = vld [vmem:[%s441_s4] ss:$0 sm:$0xff]  ;;  %s339_s1 = smov [#allocation5]  }
   0xc   :  { %s238_s16 = sshll.u32 %s339_s1, 4  ;;  %s239_s16 = int_to_ptr.vmem [resolvable:$true] %s238_s16 }
   0xd   :  { %s315_s17 = scalar_lea.vmem %s239_s16, 256  ;;  %p320_p1 = scmp.lt.s32.totalorder %s239_s16, %s239_s16 }
   0xe   :  { %p316_p0 = scmp.ne.s32.totalorder %s239_s16, %s315_s17  ;;  %p321_p2 = scmp.lt.s32.totalorder %s315_s17, %s315_s17 }
  0x10   :  { %p322_p3 = por %p321_p2, %p320_p1 }
  0x12   :  { %276 = vmatpush3.bf16.xpose.msra.mxu0 %v185_v18  ;;  %p323_p4 = pnand %p322_p3, %p316_p0 }
  0x13   :  { %277 = vmatprep.subr.bf16.mxu0 %v337_v5 }
  0x1a   :  { %278 = vmatpush3.bf16.xpose.msra.mxu0 %v182_v20 }
  0x1b   :  { %279 = vmatprep.subr.bf16.mxu0 %v337_v5 }
  0x22   :  { %280 = vmatpush3.bf16.xpose.msra.mxu0 %v179_v22 }
  0x23   :  { %281 = vmatprep.subr.bf16.mxu0 %v337_v5 }
  0x2a   :  { %282 = vmatpush3.bf16.xpose.msra.mxu0 %v176_v24 }
  0x2b   :  { %283 = vmatprep.subr.bf16.mxu0 %v337_v5 }
  0x32   :  { %284 = vmatpush3.bf16.xpose.msra.mxu0 %v173_v26 }
  0x33   :  { %285 = vmatprep.subr.bf16.mxu0 %v337_v5 }
  0x3a   :  { %286 = vmatpush3.bf16.xpose.msra.mxu0 %v170_v28 }
  0x3b   :  { %287 = vmatprep.subr.bf16.mxu0 %v337_v5 }
  0x42   :  { %288 = vmatpush3.bf16.xpose.msra.mxu0 %v167_v30 }
  0x8c   :  { %v33_v7 = vpop.xlane.xlu0 %32 }
  0x8d   :  { %v38_v8 = vmul.f32 0.03125, %v33_v7 }
  0x8f   :  { %v384_v9 = vsub.f32 %v28_v0, %v38_v8 }
  0x90   :  { %v36_v10 = vpop.xlane.xlu0 %35 }
  0x91   :  { %v39_v11 = vmul.f32 0.03125, %v36_v10  ;;  %v42_v12 = vmul.f32 %v384_v9, %v384_v9 }
  0x93   :  { %v388_v13 = vsub.f32 %v29_v1, %v39_v11  ;;  %v44_v14 = vsel %vm30_vm0, %v42_v12, 0.0 }
  0x94   :  { %45 = vadd.xlane.f32.xlu1 %v44_v14 }
  0x95   :  { %v43_v15 = vmul.f32 %v388_v13, %v388_v13 }
  0x97   :  { %v47_v16 = vsel %vm30_vm0, %v43_v15, 0.0 }
  0x98   :  { %48 = vadd.xlane.f32.xlu1 %v47_v16 }
 0x11d   :  { %v46_v31 = vpop.xlane.xlu1 %45 }
 0x11e   :  { %v51_v32 = vmul.f32 0.032258064, %v46_v31 }
 0x120   :  { %307 = vrsqrt.f32 %v51_v32  ;;  %vm55_vm2 = vcmp.eq.f32.partialorder %v51_v32, inf  ;;  %v58_v37 = vand.u32 2147483648, %v51_v32  ;;  %vm57_vm3 = vcmp.eq.f32.partialorder %v51_v32, 0.0 }
 0x121   :  { %v49_v33 = vpop.xlane.xlu1 %48 }
 0x122   :  { %v52_v34 = vmul.f32 0.032258064, %v49_v33 }
 0x124   :  { %309 = vrsqrt.f32 %v52_v34  ;;  %vm62_vm4 = vcmp.eq.f32.partialorder %v52_v34, inf  ;;  %v65_v43 = vand.u32 2147483648, %v52_v34  ;;  %vm64_vm5 = vcmp.eq.f32.partialorder %v52_v34, 0.0 }
 0x12d   :  { %v308_v35 = vpop.eup %307 }
 0x12e   :  { %v54_v36 = vmul.f32 %v308_v35, %v51_v32 }
 0x130   :  { %v56_v38 = vsel %vm55_vm2, %v51_v32, %v54_v36 }
 0x131   :  { %v310_v39 = vpop.eup %309  ;;  %v59_v40 = vsel %vm57_vm3, %v58_v37, %v56_v38 }
 0x132   :  { %v67_v41 = vadd.f32 1e-09, %v59_v40  ;;  %v61_v42 = vmul.f32 %v310_v39, %v52_v34 }
 0x134   :  { %311 = vrcp.f32 %v67_v41  ;;  %v63_v44 = vsel %vm62_vm4, %v52_v34, %v61_v42 }
 0x135   :  { %v66_v45 = vsel %vm64_vm5, %v65_v43, %v63_v44 }
 0x136   :  { %v68_v46 = vadd.f32 1e-09, %v66_v45 }
 0x138   :  { %313 = vrcp.f32 %v68_v46 }
 0x141   :  { %v312_v48 = vpop.eup %311 }
 0x142   :  { %v74_v49 = vmul.f32 %v312_v48, %v73_v47 }
 0x144   :  { %v76_v51 = vmul.f32 %v74_v49, %v384_v9 }
 0x145   :  { %v314_v52 = vpop.eup %313 }
 0x146   :  { %v79_v53 = vadd.f32 %v78_v50, %v76_v51  ;;  %v75_v54 = vmul.f32 %v314_v52, %v73_v47 }
 0x148   :  { %v262_v55 = vpack.c.bf16 %v79_v53, %v79_v53  ;;  %v77_v56 = vmul.f32 %v75_v54, %v388_v13 }
 0x14a   :  { %v80_v57 = vadd.f32 %v78_v50, %v77_v56  ;;  %90 = vst.msk [vmem:[#allocation2] sm:$0xf] %vm89_vm6, %v262_v55 }
 0x14c   :  { %v263_v58 = vpack.c.bf16 %v80_v57, %v80_v57 }
 0x14e   :  { %91 = vst.msk [vmem:[#allocation2 + $0x4] sm:$0xf] %vm89_vm6, %v263_v58 }
 0x155   :  { %v306_v59 = vld [vmem:[#allocation2] sm:$0xff]  }
 0x156   :  { %290 = vmatmul.mubr.msk.bf16.vlgmr.msra.gmra.mxu0 %vm30_vm0, %v306_v59 }
 0x216   :  { %v224_v61 = vpop.f32.mrf.mxu0 }
 0x217   :  { %v225_v62 = vadd.f32 %v251_v60, %v224_v61 }
 0x218   :  { %v291_v63 = vpop.f32.mrf.mxu0 }
 0x219   :  { %231 = vst [vmem:[#allocation5] sm:$0xff] %v225_v62 }
 0x21a   :  { %v227_v0 = vpop.f32.mrf.mxu0 }
 0x21b   :  { %v228_v1 = vadd.f32 %v251_v60, %v227_v0 }
 0x21c   :  { %v292_v2 = vpop.f32.mrf.mxu0 }
 0x21d   :  { %232 = vst [vmem:[#allocation5 + $0x8] sm:$0xff] %v228_v1 }
 0x21e   :  { %326 = shalt.err (!%p323_p4)
}
 0x21f   :  { %s340_s18 = smov 128   ;;  %s341_s4 = smov 8  }
 0x220   :  { %244 = dma.vmem_to_hbm [thread:$0]  %s239_s16, 256, %s442_s5, [#allocation6], %s340_s18, %s340_s18, %s341_s4  }
 0x221   :  { %335 = dma.done.wait [#allocation6], 256  }
 0x222   :  { %336 = vsyncadd [#allocation6], 4294967040 }
 0x223   :  { %248 = vsyncpa [#allocation6], 1 }

</bundles_post_ra>
